<compile_context>
chip_gen: v5e
topology: v5e:2x2
jax: 0.10.0
libtpu: 0.0.40
codegen_flags: <defaults>
</compile_context>

<pallas_src>
import jax
import jax.numpy as jnp
from jax.experimental import pallas as pl
from jax.experimental.pallas import tpu as pltpu


def _pa_kernel_vpu(x_ref, w_ref, b_ref, o_ref):
    """Small-channel path: unrolled channel contraction on the VPU.

    x_ref: (C, T) VMEM block (channels on sublanes, spatial on lanes)
    w_ref: (C, C) SMEM f32    b_ref: (C,) SMEM f32    o_ref: (C, T) VMEM
    """
    c = x_ref.shape[0]
    x = x_ref[...].astype(jnp.float32)                 # (C, T)
    for o in range(c):
        y = b_ref[o] + w_ref[o, 0] * x[0:1, :]         # (1, T)
        for i in range(1, c):
            y = y + w_ref[o, i] * x[i:i + 1, :]
        attn = jax.nn.sigmoid(y)
        o_ref[o:o + 1, :] = (x[o:o + 1, :] * attn).astype(o_ref.dtype)


def _pa_kernel_mxu(x_ref, w_ref, b_ref, o_ref):
    """General path: channel contraction on the MXU.

    x_ref: (C, T) VMEM    w_ref: (C, C) VMEM    b_ref: (C, 1) VMEM f32
    """
    x = x_ref[...]
    y = jnp.dot(w_ref[...], x, preferred_element_type=jnp.float32)   # (C, T)
    y = y + b_ref[...]
    attn = jax.nn.sigmoid(y)
    o_ref[...] = (x.astype(jnp.float32) * attn).astype(o_ref.dtype)


def _round_up(v, m):
    return ((v + m - 1) // m) * m


def pa_forward(x_nchw, weight, bias, *, tile_hw=None, vpu_channel_cutoff=16):
    """x_nchw: (N, C, H, W); weight: (C, C, 1, 1); bias: (C,)."""
    N, C, H, W = x_nchw.shape
    assert weight.shape[0] == C and weight.shape[1] == C, (
        "PA requires C_out == C_in == C")
    HW = H * W

    x3 = x_nchw.reshape(N, C, HW)          # free reshape, no data movement
    w2d = weight.reshape(C, C)             # (C_out, C_in)

    itemsize = jnp.dtype(x_nchw.dtype).itemsize
    if tile_hw is None:
        # Double-buffered input + output blocks ~= 4 * C * tile_hw * itemsize.
        # Keep that well under the scoped VMEM budget (v7x: 32 MiB scoped).
        budget_bytes = 16 * 1024 * 1024
        max_tile = max(128, (budget_bytes // (4 * C * itemsize)) // 128 * 128)
        tile_hw = min(2048, _round_up(HW, 128), max_tile)

    grid = (N, pl.cdiv(HW, tile_hw))       # ragged tail handled by masking

    x_spec = pl.BlockSpec((None, C, tile_hw), lambda n, j: (n, 0, j))
    out_spec = pl.BlockSpec((None, C, tile_hw), lambda n, j: (n, 0, j))

    if C <= vpu_channel_cutoff:
        # Tiny C: a CxC matmul wastes the MXU; unroll on the VPU, params in SMEM.
        kernel = _pa_kernel_vpu
        in_specs = [
            x_spec,
            pl.BlockSpec(memory_space=pltpu.MemorySpace.SMEM),
            pl.BlockSpec(memory_space=pltpu.MemorySpace.SMEM),
        ]
        w_arg = w2d.astype(jnp.float32)
        b_arg = bias.astype(jnp.float32)
    else:
        kernel = _pa_kernel_mxu
        in_specs = [
            x_spec,
            pl.BlockSpec((C, C), lambda n, j: (0, 0)),
            pl.BlockSpec((C, 1), lambda n, j: (0, 0)),
        ]
        w_arg = w2d.astype(x_nchw.dtype)
        b_arg = bias.astype(jnp.float32).reshape(C, 1)

    out3 = pl.pallas_call(
        kernel,
        out_shape=jax.ShapeDtypeStruct((N, C, HW), x_nchw.dtype),
        grid_spec=pltpu.PrefetchScalarGridSpec(
            num_scalar_prefetch=0,
            grid=grid,
            in_specs=in_specs,
            out_specs=out_spec,
        ),
        compiler_params=pltpu.CompilerParams(
            dimension_semantics=("parallel", "parallel"),
            vmem_limit_bytes=32 * 1024 * 1024,
        ),
    )(x3, w_arg, b_arg)

    return out3.reshape(N, C, H, W)


def pa_reference(x_nchw, weight, bias):
    """Pure-JAX reference (conv1x1 + sigmoid + mul) for correctness check."""
    N, C, H, W = x_nchw.shape
    w2d = weight.reshape(C, C)             # (C_out, C_in)
    y = jnp.einsum("nchw,oc->nohw", x_nchw, w2d,
                   precision=jax.lax.Precision.HIGHEST)
    y = y + bias.reshape(1, C, 1, 1)
    return x_nchw * jax.nn.sigmoid(y)


if __name__ == "__main__":
    key = jax.random.PRNGKey(0)
    k_x, k_w, k_b = jax.random.split(key, 3)

    # --- Test 1: small channel count (VPU path), nf = 4 ---
    N, C, H, W = 2, 4, 16, 16
    x = jax.random.normal(k_x, (N, C, H, W), dtype=jnp.float32)
    weight = jax.random.normal(k_w, (C, C, 1, 1), dtype=jnp.float32) * 0.5
    bias = jax.random.normal(k_b, (C,), dtype=jnp.float32) * 0.1

    out = jax.block_until_ready(pa_forward(x, weight, bias))
    ref = pa_reference(x, weight, bias)
    assert out.shape == (N, C, H, W)
    assert jnp.allclose(out, ref, atol=1e-4, rtol=1e-4), "VPU path mismatch"

    # --- Test 2: larger channel count (MXU path) + ragged spatial size ---
    N2, C2, H2, W2 = 2, 32, 10, 13          # H*W = 130, not a multiple of 128
    x2 = jax.random.normal(k_x, (N2, C2, H2, W2), dtype=jnp.float32)
    w2 = jax.random.normal(k_w, (C2, C2, 1, 1), dtype=jnp.float32) * 0.1
    b2 = jax.random.normal(k_b, (C2,), dtype=jnp.float32) * 0.1
    out2 = jax.block_until_ready(pa_forward(x2, w2, b2))
    ref2 = pa_reference(x2, w2, b2)
    assert out2.shape == (N2, C2, H2, W2)
    # looser tolerance: Pallas MXU f32 vs XLA HIGHEST einsum rounding differs
    assert jnp.allclose(out2, ref2, atol=2e-3, rtol=2e-3), "MXU path mismatch"

    print("KERNEL_OK")
</pallas_src>

<mosaic_0001>
module attributes {stable_mosaic.version = 11 : i64} {
  func.func @_pa_kernel_vpu(%arg0: i32, %arg1: i32, %arg2: memref<1x4x256xf32, #tpu.memory_space<vmem>>, %arg3: memref<4x4xf32, #tpu.memory_space<smem>>, %arg4: memref<4xf32, #tpu.memory_space<smem>>, %arg5: memref<1x4x256xf32, #tpu.memory_space<vmem>>) attributes {dimension_semantics = [#tpu.dimension_semantics<parallel>, #tpu.dimension_semantics<parallel>], iteration_bounds = array<i64: 2, 1>, scalar_prefetch = 0 : i64, scratch_operands = 0 : i64, tpu.core_type = #tpu.core_type<tc>, window_params = [{transform_indices = @transform_0, window_bounds = array<i64: 1, 4, 256>}, {transform_indices = @transform_1, window_bounds = array<i64: 4, 4>}, {transform_indices = @transform_2, window_bounds = array<i64: 4>}, {transform_indices = @transform_3, window_bounds = array<i64: 1, 4, 256>}]} {
    %c0 = arith.constant 0 : index
    %c0_0 = arith.constant 0 : index
    %c0_1 = arith.constant 0 : index
    %0 = vector.load %arg2[%c0, %c0_0, %c0_1] : memref<1x4x256xf32, #tpu.memory_space<vmem>>, vector<1x4x256xf32>
    %1 = vector.shape_cast %0 : vector<1x4x256xf32> to vector<4x256xf32>
    %c0_2 = arith.constant 0 : index
    %2 = memref.load %arg4[%c0_2] : memref<4xf32, #tpu.memory_space<smem>>
    %c0_3 = arith.constant 0 : index
    %c0_4 = arith.constant 0 : index
    %3 = memref.load %arg3[%c0_3, %c0_4] : memref<4x4xf32, #tpu.memory_space<smem>>
    %4 = vector.extract_strided_slice %1 {offsets = [0, 0], sizes = [1, 256], strides = [1, 1]} : vector<4x256xf32> to vector<1x256xf32>
    %5 = vector.broadcast %3 : f32 to vector<1x256xf32>
    %6 = arith.mulf %5, %4 : vector<1x256xf32>
    %7 = vector.broadcast %2 : f32 to vector<1x256xf32>
    %8 = arith.addf %7, %6 : vector<1x256xf32>
    %c0_5 = arith.constant 0 : index
    %c1 = arith.constant 1 : index
    %9 = memref.load %arg3[%c0_5, %c1] : memref<4x4xf32, #tpu.memory_space<smem>>
    %10 = vector.extract_strided_slice %1 {offsets = [1, 0], sizes = [1, 256], strides = [1, 1]} : vector<4x256xf32> to vector<1x256xf32>
    %11 = vector.broadcast %9 : f32 to vector<1x256xf32>
    %12 = arith.mulf %11, %10 : vector<1x256xf32>
    %13 = arith.addf %8, %12 : vector<1x256xf32>
    %c0_6 = arith.constant 0 : index
    %c2 = arith.constant 2 : index
    %14 = memref.load %arg3[%c0_6, %c2] : memref<4x4xf32, #tpu.memory_space<smem>>
    %15 = vector.extract_strided_slice %1 {offsets = [2, 0], sizes = [1, 256], strides = [1, 1]} : vector<4x256xf32> to vector<1x256xf32>
    %16 = vector.broadcast %14 : f32 to vector<1x256xf32>
    %17 = arith.mulf %16, %15 : vector<1x256xf32>
    %18 = arith.addf %13, %17 : vector<1x256xf32>
    %c0_7 = arith.constant 0 : index
    %c3 = arith.constant 3 : index
    %19 = memref.load %arg3[%c0_7, %c3] : memref<4x4xf32, #tpu.memory_space<smem>>
    %20 = vector.extract_strided_slice %1 {offsets = [3, 0], sizes = [1, 256], strides = [1, 1]} : vector<4x256xf32> to vector<1x256xf32>
    %21 = vector.broadcast %19 : f32 to vector<1x256xf32>
    %22 = arith.mulf %21, %20 : vector<1x256xf32>
    %23 = arith.addf %18, %22 : vector<1x256xf32>
    %24 = arith.negf %23 : vector<1x256xf32>
    %25 = math.exp %24 : vector<1x256xf32>
    %cst = arith.constant 1.000000e+00 : f32
    %26 = vector.broadcast %cst : f32 to vector<1x256xf32>
    %27 = arith.addf %26, %25 : vector<1x256xf32>
    %28 = arith.divf %26, %27 : vector<1x256xf32>
    %29 = vector.extract_strided_slice %1 {offsets = [0, 0], sizes = [1, 256], strides = [1, 1]} : vector<4x256xf32> to vector<1x256xf32>
    %30 = arith.mulf %29, %28 : vector<1x256xf32>
    %c0_8 = arith.constant 0 : index
    %c0_9 = arith.constant 0 : index
    %c0_10 = arith.constant 0 : index
    %31 = vector.load %arg5[%c0_8, %c0_9, %c0_10] : memref<1x4x256xf32, #tpu.memory_space<vmem>>, vector<1x1x256xf32>
    %32 = vector.shape_cast %31 : vector<1x1x256xf32> to vector<1x256xf32>
    %33 = vector.shape_cast %30 : vector<1x256xf32> to vector<1x1x256xf32>
    tpu.vector_store %arg5[%c0_8, %c0_9, %c0_10], %33 {strides = array<i32>} : memref<1x4x256xf32, #tpu.memory_space<vmem>>, vector<1x1x256xf32>,
    %c1_11 = arith.constant 1 : index
    %34 = memref.load %arg4[%c1_11] : memref<4xf32, #tpu.memory_space<smem>>
    %c1_12 = arith.constant 1 : index
    %c0_13 = arith.constant 0 : index
    %35 = memref.load %arg3[%c1_12, %c0_13] : memref<4x4xf32, #tpu.memory_space<smem>>
    %36 = vector.extract_strided_slice %1 {offsets = [0, 0], sizes = [1, 256], strides = [1, 1]} : vector<4x256xf32> to vector<1x256xf32>
    %37 = vector.broadcast %35 : f32 to vector<1x256xf32>
    %38 = arith.mulf %37, %36 : vector<1x256xf32>
    %39 = vector.broadcast %34 : f32 to vector<1x256xf32>
    %40 = arith.addf %39, %38 : vector<1x256xf32>
    %c1_14 = arith.constant 1 : index
    %c1_15 = arith.constant 1 : index
    %41 = memref.load %arg3[%c1_14, %c1_15] : memref<4x4xf32, #tpu.memory_space<smem>>
    %42 = vector.extract_strided_slice %1 {offsets = [1, 0], sizes = [1, 256], strides = [1, 1]} : vector<4x256xf32> to vector<1x256xf32>
    %43 = vector.broadcast %41 : f32 to vector<1x256xf32>
    %44 = arith.mulf %43, %42 : vector<1x256xf32>
    %45 = arith.addf %40, %44 : vector<1x256xf32>
    %c1_16 = arith.constant 1 : index
    %c2_17 = arith.constant 2 : index
    %46 = memref.load %arg3[%c1_16, %c2_17] : memref<4x4xf32, #tpu.memory_space<smem>>
    %47 = vector.extract_strided_slice %1 {offsets = [2, 0], sizes = [1, 256], strides = [1, 1]} : vector<4x256xf32> to vector<1x256xf32>
    %48 = vector.broadcast %46 : f32 to vector<1x256xf32>
    %49 = arith.mulf %48, %47 : vector<1x256xf32>
    %50 = arith.addf %45, %49 : vector<1x256xf32>
    %c1_18 = arith.constant 1 : index
    %c3_19 = arith.constant 3 : index
    %51 = memref.load %arg3[%c1_18, %c3_19] : memref<4x4xf32, #tpu.memory_space<smem>>
    %52 = vector.extract_strided_slice %1 {offsets = [3, 0], sizes = [1, 256], strides = [1, 1]} : vector<4x256xf32> to vector<1x256xf32>
    %53 = vector.broadcast %51 : f32 to vector<1x256xf32>
    %54 = arith.mulf %53, %52 : vector<1x256xf32>
    %55 = arith.addf %50, %54 : vector<1x256xf32>
    %56 = arith.negf %55 : vector<1x256xf32>
    %57 = math.exp %56 : vector<1x256xf32>
    %cst_20 = arith.constant 1.000000e+00 : f32
    %58 = vector.broadcast %cst_20 : f32 to vector<1x256xf32>
    %59 = arith.addf %58, %57 : vector<1x256xf32>
    %60 = arith.divf %58, %59 : vector<1x256xf32>
    %61 = vector.extract_strided_slice %1 {offsets = [1, 0], sizes = [1, 256], strides = [1, 1]} : vector<4x256xf32> to vector<1x256xf32>
    %62 = arith.mulf %61, %60 : vector<1x256xf32>
    %c0_21 = arith.constant 0 : index
    %c1_22 = arith.constant 1 : index
    %c0_23 = arith.constant 0 : index
    %63 = vector.load %arg5[%c0_21, %c1_22, %c0_23] : memref<1x4x256xf32, #tpu.memory_space<vmem>>, vector<1x1x256xf32>
    %64 = vector.shape_cast %63 : vector<1x1x256xf32> to vector<1x256xf32>
    %65 = vector.shape_cast %62 : vector<1x256xf32> to vector<1x1x256xf32>
    tpu.vector_store %arg5[%c0_21, %c1_22, %c0_23], %65 {strides = array<i32>} : memref<1x4x256xf32, #tpu.memory_space<vmem>>, vector<1x1x256xf32>,
    %c2_24 = arith.constant 2 : index
    %66 = memref.load %arg4[%c2_24] : memref<4xf32, #tpu.memory_space<smem>>
    %c2_25 = arith.constant 2 : index
    %c0_26 = arith.constant 0 : index
    %67 = memref.load %arg3[%c2_25, %c0_26] : memref<4x4xf32, #tpu.memory_space<smem>>
    %68 = vector.extract_strided_slice %1 {offsets = [0, 0], sizes = [1, 256], strides = [1, 1]} : vector<4x256xf32> to vector<1x256xf32>
    %69 = vector.broadcast %67 : f32 to vector<1x256xf32>
    %70 = arith.mulf %69, %68 : vector<1x256xf32>
    %71 = vector.broadcast %66 : f32 to vector<1x256xf32>
    %72 = arith.addf %71, %70 : vector<1x256xf32>
    %c2_27 = arith.constant 2 : index
    %c1_28 = arith.constant 1 : index
    %73 = memref.load %arg3[%c2_27, %c1_28] : memref<4x4xf32, #tpu.memory_space<smem>>
    %74 = vector.extract_strided_slice %1 {offsets = [1, 0], sizes = [1, 256], strides = [1, 1]} : vector<4x256xf32> to vector<1x256xf32>
    %75 = vector.broadcast %73 : f32 to vector<1x256xf32>
    %76 = arith.mulf %75, %74 : vector<1x256xf32>
    %77 = arith.addf %72, %76 : vector<1x256xf32>
    %c2_29 = arith.constant 2 : index
    %c2_30 = arith.constant 2 : index
    %78 = memref.load %arg3[%c2_29, %c2_30] : memref<4x4xf32, #tpu.memory_space<smem>>
    %79 = vector.extract_strided_slice %1 {offsets = [2, 0], sizes = [1, 256], strides = [1, 1]} : vector<4x256xf32> to vector<1x256xf32>
    %80 = vector.broadcast %78 : f32 to vector<1x256xf32>
    %81 = arith.mulf %80, %79 : vector<1x256xf32>
    %82 = arith.addf %77, %81 : vector<1x256xf32>
    %c2_31 = arith.constant 2 : index
    %c3_32 = arith.constant 3 : index
    %83 = memref.load %arg3[%c2_31, %c3_32] : memref<4x4xf32, #tpu.memory_space<smem>>
    %84 = vector.extract_strided_slice %1 {offsets = [3, 0], sizes = [1, 256], strides = [1, 1]} : vector<4x256xf32> to vector<1x256xf32>
    %85 = vector.broadcast %83 : f32 to vector<1x256xf32>
    %86 = arith.mulf %85, %84 : vector<1x256xf32>
    %87 = arith.addf %82, %86 : vector<1x256xf32>
    %88 = arith.negf %87 : vector<1x256xf32>
    %89 = math.exp %88 : vector<1x256xf32>
    %cst_33 = arith.constant 1.000000e+00 : f32
    %90 = vector.broadcast %cst_33 : f32 to vector<1x256xf32>
    %91 = arith.addf %90, %89 : vector<1x256xf32>
    %92 = arith.divf %90, %91 : vector<1x256xf32>
    %93 = vector.extract_strided_slice %1 {offsets = [2, 0], sizes = [1, 256], strides = [1, 1]} : vector<4x256xf32> to vector<1x256xf32>
    %94 = arith.mulf %93, %92 : vector<1x256xf32>
    %c0_34 = arith.constant 0 : index
    %c2_35 = arith.constant 2 : index
    %c0_36 = arith.constant 0 : index
    %95 = vector.load %arg5[%c0_34, %c2_35, %c0_36] : memref<1x4x256xf32, #tpu.memory_space<vmem>>, vector<1x1x256xf32>
    %96 = vector.shape_cast %95 : vector<1x1x256xf32> to vector<1x256xf32>
    %97 = vector.shape_cast %94 : vector<1x256xf32> to vector<1x1x256xf32>
    tpu.vector_store %arg5[%c0_34, %c2_35, %c0_36], %97 {strides = array<i32>} : memref<1x4x256xf32, #tpu.memory_space<vmem>>, vector<1x1x256xf32>,
    %c3_37 = arith.constant 3 : index
    %98 = memref.load %arg4[%c3_37] : memref<4xf32, #tpu.memory_space<smem>>
    %c3_38 = arith.constant 3 : index
    %c0_39 = arith.constant 0 : index
    %99 = memref.load %arg3[%c3_38, %c0_39] : memref<4x4xf32, #tpu.memory_space<smem>>
    %100 = vector.extract_strided_slice %1 {offsets = [0, 0], sizes = [1, 256], strides = [1, 1]} : vector<4x256xf32> to vector<1x256xf32>
    %101 = vector.broadcast %99 : f32 to vector<1x256xf32>
    %102 = arith.mulf %101, %100 : vector<1x256xf32>
    %103 = vector.broadcast %98 : f32 to vector<1x256xf32>
    %104 = arith.addf %103, %102 : vector<1x256xf32>
    %c3_40 = arith.constant 3 : index
    %c1_41 = arith.constant 1 : index
    %105 = memref.load %arg3[%c3_40, %c1_41] : memref<4x4xf32, #tpu.memory_space<smem>>
    %106 = vector.extract_strided_slice %1 {offsets = [1, 0], sizes = [1, 256], strides = [1, 1]} : vector<4x256xf32> to vector<1x256xf32>
    %107 = vector.broadcast %105 : f32 to vector<1x256xf32>
    %108 = arith.mulf %107, %106 : vector<1x256xf32>
    %109 = arith.addf %104, %108 : vector<1x256xf32>
    %c3_42 = arith.constant 3 : index
    %c2_43 = arith.constant 2 : index
    %110 = memref.load %arg3[%c3_42, %c2_43] : memref<4x4xf32, #tpu.memory_space<smem>>
    %111 = vector.extract_strided_slice %1 {offsets = [2, 0], sizes = [1, 256], strides = [1, 1]} : vector<4x256xf32> to vector<1x256xf32>
    %112 = vector.broadcast %110 : f32 to vector<1x256xf32>
    %113 = arith.mulf %112, %111 : vector<1x256xf32>
    %114 = arith.addf %109, %113 : vector<1x256xf32>
    %c3_44 = arith.constant 3 : index
    %c3_45 = arith.constant 3 : index
    %115 = memref.load %arg3[%c3_44, %c3_45] : memref<4x4xf32, #tpu.memory_space<smem>>
    %116 = vector.extract_strided_slice %1 {offsets = [3, 0], sizes = [1, 256], strides = [1, 1]} : vector<4x256xf32> to vector<1x256xf32>
    %117 = vector.broadcast %115 : f32 to vector<1x256xf32>
    %118 = arith.mulf %117, %116 : vector<1x256xf32>
    %119 = arith.addf %114, %118 : vector<1x256xf32>
    %120 = arith.negf %119 : vector<1x256xf32>
    %121 = math.exp %120 : vector<1x256xf32>
    %cst_46 = arith.constant 1.000000e+00 : f32
    %122 = vector.broadcast %cst_46 : f32 to vector<1x256xf32>
    %123 = arith.addf %122, %121 : vector<1x256xf32>
    %124 = arith.divf %122, %123 : vector<1x256xf32>
    %125 = vector.extract_strided_slice %1 {offsets = [3, 0], sizes = [1, 256], strides = [1, 1]} : vector<4x256xf32> to vector<1x256xf32>
    %126 = arith.mulf %125, %124 : vector<1x256xf32>
    %c0_47 = arith.constant 0 : index
    %c3_48 = arith.constant 3 : index
    %c0_49 = arith.constant 0 : index
    %127 = vector.load %arg5[%c0_47, %c3_48, %c0_49] : memref<1x4x256xf32, #tpu.memory_space<vmem>>, vector<1x1x256xf32>
    %128 = vector.shape_cast %127 : vector<1x1x256xf32> to vector<1x256xf32>
    %129 = vector.shape_cast %126 : vector<1x256xf32> to vector<1x1x256xf32>
    tpu.vector_store %arg5[%c0_47, %c3_48, %c0_49], %129 {strides = array<i32>} : memref<1x4x256xf32, #tpu.memory_space<vmem>>, vector<1x1x256xf32>,
    return
  }
  func.func @transform_0(%arg0: i32, %arg1: i32) -> (i32, i32, i32) {
    %c0_i32 = arith.constant 0 : i32
    %c0_i32_0 = arith.constant 0 : i32
    return %arg0, %c0_i32, %arg1 : i32, i32, i32
  }
  func.func @transform_1(%arg0: i32, %arg1: i32) -> (i32, i32) {
    %c0_i32 = arith.constant 0 : i32
    %c0_i32_0 = arith.constant 0 : i32
    %c0_i32_1 = arith.constant 0 : i32
    return %c0_i32, %c0_i32_0 : i32, i32
  }
  func.func @transform_2(%arg0: i32, %arg1: i32) -> i32 {
    %c0_i32 = arith.constant 0 : i32
    %c0_i32_0 = arith.constant 0 : i32
    return %c0_i32 : i32
  }
  func.func @transform_3(%arg0: i32, %arg1: i32) -> (i32, i32, i32) {
    %c0_i32 = arith.constant 0 : i32
    %c0_i32_0 = arith.constant 0 : i32
    return %arg0, %c0_i32, %arg1 : i32, i32, i32
  }
}

</mosaic_0001>

<bundles_post_ra>
// kernel: tpu_custom_call.1
= control target key start
LH: loop header
LB: loop body
LE: loop exit
PB: predicated region body
PF: predicated region fallthrough
CT: control target
= control target key end

     0   :  { %8 = vsyncpa [#allocation3], 0  ;;  %s1134_s0 = inlined_call_operand.hbm [shape: f32[2,4,256], index: 0, kind: input, shape index: {}]   ;;  %s1135_s1 = inlined_call_operand.hbm [shape: f32[4,4], index: 1, kind: input, shape index: {}]   ;;  %s1136_s2 = inlined_call_operand.vmem [shape: f32[4], index: 2, kind: input, shape index: {}]   ;;  %s1137_s3 = inlined_call_operand.hbm [shape: f32[2,4,256], index: 3, kind: output, shape index: {}]  }
   0x1   :  { %10 = vsyncpa [#allocation3 + $0x1], 0 }
   0x2   :  { %11 = vsyncpa [#allocation5], 0 }
   0x3   :  { %12 = vsyncpa [#allocation6], 0 }
   0x4   :  { %13 = vsyncpa [#allocation4], 0 }
   0x5   :  { %15 = vsyncpa [#allocation4 + $0x1], 0  ;;  %s935_s12 = smov 0   ;;  %s937_s13 = smov 0  }
   0x6   :  { %s939_s14 = smov 0   ;;  %s941_s15 = smov 0  }
   0x7   :  { %s943_s16 = smov 0   ;;  %s945_s17 = smov 0  }
   0x8 LB: > { %s604_s18 = sadd.s32 4294967295, %s911_s17   ;;  %s605_s19 = sadd.s32 4294967294, %s911_s17   ;;  %s911_s17 = sphi %s945_s17, %s21_s17   ;;  %s907_s16 = sphi %s943_s16, %s1151_s16   ;;  %s903_s15 = sphi %s941_s15, %s1150_s15   ;;  %s899_s14 = sphi %s939_s14, %s1149_s14   ;;  %s895_s13 = sphi %s937_s13, %s1148_s13   ;;  %s891_s12 = sphi %s935_s12, %s1147_s12  }
   0x9   : > { %p55_p0 = scmp.ne.s32.totalorder %s895_s13, %s891_s12  ;;  %p969_p1 = scmp.eq.s32.totalorder %s604_s18, 0 }
   0xa   : > { %p129_p2 = scmp.eq.s32.totalorder %s605_s19, 1  ;;  %p606_p4 = scmp.ge.s32.totalorder %s911_s17, 1 }
   0xb   : > { %p975_p3 = por %p969_p1, %p55_p0  ;;  %p136_p6 = scmp.lt.s32.totalorder %s911_s17, 3 }
   0xc   : > { %p980_p5 = por %p129_p2, %p55_p0  ;;  %s148_s25 = sshll.u32 %s1135_s1, 4  ;;  %s149_s25 = int_to_ptr.hbm [resolvable:$true] %s148_s25 }
   0xd   : > { %p988_p7 = pnand %p606_p4, %p136_p6  ;;  %p609_p8 = scmp.ge.s32.totalorder %s911_s17, 2 }
   0xe   : > { %s158_s29 = sshll.u32 %s1136_s2, 4  ;;  %s913_s30 = smov [#allocation7]   ;;  %s159_s29 = int_to_ptr.vmem [resolvable:$true] %s158_s29 }
   0xf   : > { %p674_p9 = pneg %p988_p7  ;;  %s914_s4 = smov [#allocation8]  }
  0x10   : > { %p123_p11 = scmp.eq.s32.totalorder %s604_s18, 1  ;;  %s33_s5 = sadd.s32 1, %s907_s16 }
  0x11   : > { %p675_p10 = pnand %p674_p9, %p969_p1  ;;  %p35_p12 = scmp.ge.s32.totalorder %s33_s5, 2 }
  0x12   : > { %s42_s6 = sadd.s32 1, %s899_s14  ;;  %p49_p13 = scmp.ne.s32.totalorder %s899_s14, %s895_s13 }
  0x13   : > { %677 = dma.hbm_to_smem (!%p675_p10), %s149_s25, 64, %s913_s30, [#allocation5]  }
  0x14   : > { %680 = dma.vmem_to_smem (!%p675_p10), %s159_s29, 16, %s914_s4, [#allocation6]  }
  0x15   : > { %p50_p0 = scmp.eq.s32.totalorder %s911_s17, 0  ;;  %s1153_s5 = smov (%p35_p12, %s33_s5), 0 }
  0x16   : > { %p1007_p2 = por %p123_p11, %p49_p13  ;;  %p691_p4 = scmp.lt.s32.totalorder %s911_s17, 2 }
  0x17   : > { %s37_s8 = ssub.s32 %s907_s16, %s1153_s5  ;;  %s169_s9 = sand.u32 1, %s899_s14  }
  0x18   : > { %p40_p6 = scmp.eq.s32.totalorder %s37_s8, 0  ;;  %p51_p9 = por %p50_p0, %p49_p13 }
  0x19   : > { %s610_s10 = sshll.u32 %s169_s9, 3  ;;  %s660_s11 = sshll.u32 %s907_s16, 3 }
  0x1a   : > { %s1017_s18 = scalar_select %p40_p6, %s899_s14, %s42_s6  }
  0x1b   : > { %s180_s24 = scalar_lea.hbm %s1134_s0, %s660_s11  ;;  %s173_s27 = scalar_lea.vmem [#allocation2], %s610_s10 }
  0x1c   : > { %s182_s25 = sshll.u32 %s180_s24, 4  ;;  %s184_s28 = sshll.u32 %s173_s27, 4  ;;  %s183_s25 = int_to_ptr.hbm [resolvable:$true] %s182_s25  ;;  %s185_s28 = int_to_ptr.vmem [resolvable:$true] %s184_s28 }
  0x1d   : > { %p682_p10 = pnand %p691_p4, %p51_p9  ;;  %s170_s29 = scalar_lea.sflag [#allocation3], %s169_s9 }
  0x1e   : > { %193 = sbr.rel (%p988_p7) target bundleno = 122 (0x7a), region = 32  ;;  %s1027_s30 = sand.u32 (!%p988_p7), 1, %s895_s13  }
  0x1f   : > { %684 = dma.hbm_to_vmem [thread:$0]  (!%p682_p10), %s183_s25, 128, %s185_s28, %s170_s29  }
  0x20   : > { %s614_s4 = sshll.u32 (!%p988_p7), %s1027_s30, 3  ;;  %s196_s6 = scalar_lea.sflag (!%p988_p7), [#allocation3], %s1027_s30 }
  0x21   : > { %s199_s8 = scalar_lea.vmem (!%p988_p7), [#allocation2], %s614_s4 }
  0x23   : > { %874 = dma.done.wait (%p975_p3), %s196_s6, 128  }
  0x24   : > { %876 = vsyncadd (%p975_p3), %s196_s6, 4294967168 }
  0x25   : > { %878 = dma.done.wait (%p969_p1), [#allocation5], 64  }
  0x26   : > { %880 = vsyncadd (%p969_p1), [#allocation5], 4294967232 }
  0x27   : > { %882 = dma.done.wait (%p969_p1), [#allocation6], 16  }
  0x28   : > { %884 = vsyncadd (%p969_p1), [#allocation6], 4294967280 }
  0x29   : > { %215 = sfence }
  0x2a   : > { %s625_s26 = sld [smem:[#allocation8 + $0x1]]  ;;  %v1045_v0 = vld [vmem:[%s199_s8] sm:$0xff] }
  0x2b   : > { %s626_s9 = sld [smem:[#allocation7 + $0x80]] }
  0x2c   : > { %s627_s10 = sld [smem:[#allocation7 + $0x81]] }
  0x2d   : > { %s629_s11 = sld [smem:[#allocation7 + $0x82]] }
  0x2e   : > { %s631_s19 = sld [smem:[#allocation7 + $0x83]] }
  0x2f   : > { %s1047_s21 = sld [smem:[#allocation8 + $0x2]] }
  0x30   : > { %s636_s23 = sld [smem:[#allocation7 + $0x100]]  ;;  %v301_v2 = vstv %s625_s26 }
  0x31   : > { %v299_v1 = vstv %s626_s9  ;;  %s637_s24 = sld [smem:[#allocation7 + $0x101]] }
  0x32   : > { %v300_v3 = vmul.f32 %v299_v1, %v1045_v0  ;;  %v304_v4 = vstv %s627_s10  ;;  %s639_s20 = sld [smem:[#allocation7 + $0x102]] }
  0x33   : > { %v305_v5 = vmul.f32 %v304_v4, %v1045_v0  ;;  %v312_v6 = vstv %s629_s11  ;;  %s641_s25 = sld [smem:[#allocation7 + $0x103]] }
  0x34   : > { %v302_v7 = vadd.f32 %v301_v2, %v300_v3  ;;  %v313_v8 = vmul.f32 %v312_v6, %v1045_v0  ;;  %v320_v9 = vstv %s631_s19  ;;  %s1052_s27 = sld [smem:[#allocation8 + $0x3]] }
  0x35   : > { %v628_v10 = vrot.slane %v305_v5, 9  ;;  %v321_v11 = vmul.f32 %v320_v9, %v1045_v0  ;;  %s646_s28 = sld [smem:[#allocation7 + $0x180]]  ;;  %v361_v14 = vstv %s1047_s21  ;;  %s233_s21 = scalar_lea.vmem [#allocation9], %s614_s4 }
  0x36   : > { %v630_v12 = vrot.slane %v313_v8, 10  ;;  %v359_v13 = vstv %s636_s23  ;;  %s647_s29 = sld [smem:[#allocation7 + $0x181]]  ;;  %s661_s23 = sshll.u32 %s903_s15, 3 }
  0x37   : > { %v310_v15 = vadd.f32 %v628_v10, %v302_v7  ;;  %v632_v16 = vrot.slane %v321_v11, 11  ;;  %v360_v17 = vmul.f32 %v359_v13, %v1045_v0  ;;  %v364_v18 = vstv %s637_s24  ;;  %s649_s6 = sld [smem:[#allocation7 + $0x182]]  ;;  %s478_s15 = scalar_lea.sflag [#allocation4], %s1027_s30 }
  0x38   : > { %v365_v19 = vmul.f32 %v364_v18, %v1045_v0  ;;  %v372_v20 = vstv %s639_s20  ;;  %s651_s8 = sld [smem:[#allocation7 + $0x183]]  ;;  %s491_s20 = scalar_lea.hbm %s1137_s3, %s661_s23 }
  0x39   : > { %v318_v21 = vadd.f32 %v630_v12, %v310_v15  ;;  %v362_v22 = vadd.f32 %v361_v14, %v360_v17  ;;  %v373_v23 = vmul.f32 %v372_v20, %v1045_v0  ;;  %v380_v24 = vstv %s641_s25  ;;  %s1059_s26 = sld [smem:[#allocation8]]  ;;  %s493_s25 = sshll.u32 %s233_s21, 4  ;;  %s494_s25 = int_to_ptr.vmem [resolvable:$true] %s493_s25 }
  0x3a   : > { %v638_v25 = vrot.slane %v365_v19, 9  ;;  %v381_v26 = vmul.f32 %v380_v24, %v1045_v0  ;;  %s238_s9 = sld [smem:[#allocation7]]  ;;  %v421_v30 = vstv %s1052_s27  ;;  %s495_s27 = sshll.u32 %s491_s20, 4  ;;  %s496_s27 = int_to_ptr.hbm [resolvable:$true] %s495_s27 }
  0x3b   : > { %v326_v27 = vadd.f32 %v632_v16, %v318_v21  ;;  %v640_v28 = vrot.slane %v373_v23, 10  ;;  %v419_v29 = vstv %s646_s28  ;;  %s618_s10 = sld [smem:[#allocation7 + $0x1]]  ;;  %s835_s28 = sshra.s32 %s496_s27, 4  ;;  %s836_s28 = int_to_ptr.hbm [resolvable:$true] %s835_s28 }
  0x3c   : > { %v370_v31 = vadd.f32 %v638_v25, %v362_v22  ;;  %v642_v32 = vrot.slane %v381_v26, 11  ;;  %v420_v33 = vmul.f32 %v419_v29, %v1045_v0  ;;  %v424_v34 = vstv %s647_s29  ;;  %s620_s11 = sld [smem:[#allocation7 + $0x2]]  ;;  %s837_s29 = scalar_lea.hbm %s836_s28, 8 }
  0x3d   : > { %v633_v35 = vmul.f32 -1.442695, %v326_v27  ;;  %v425_v36 = vmul.f32 %v424_v34, %v1045_v0  ;;  %v432_v37 = vstv %s649_s6  ;;  %s622_s19 = sld [smem:[#allocation7 + $0x3]]  ;;  %p838_p1 = scmp.ne.s32.totalorder %s836_s28, %s837_s29 }
  0x3e   : > { %v378_v38 = vadd.f32 %v640_v28, %v370_v31  ;;  %v422_v39 = vadd.f32 %v421_v30, %v420_v33  ;;  %v433_v40 = vmul.f32 %v432_v37, %v1045_v0  ;;  %v440_v41 = vstv %s651_s8  ;;  %p842_p11 = scmp.lt.s32.totalorder %s836_s28, %s1137_s3 }
  0x3f   : > { %745 = vpow2.f32 %v633_v35  ;;  %v648_v42 = vrot.slane %v425_v36, 9  ;;  %v441_v43 = vmul.f32 %v440_v41, %v1045_v0  ;;  %v241_v47 = vstv %s1059_s26  ;;  %p839_p3 = pnand %p838_p1, %p1007_p2  ;;  %s841_s26 = scalar_lea.hbm %s1137_s3, 16 }
  0x40   : > { %v386_v44 = vadd.f32 %v642_v32, %v378_v38  ;;  %v650_v45 = vrot.slane %v433_v40, 10  ;;  %v239_v46 = vstv %s238_s9  ;;  %v292_v37 = vlaneseq  ;;  %p843_p12 = scmp.lt.s32.totalorder %s841_s26, %s837_s29 }
  0x41   : > { %v430_v48 = vadd.f32 %v648_v42, %v422_v39  ;;  %v652_v49 = vrot.slane %v441_v43, 11  ;;  %v240_v50 = vmul.f32 %v239_v46, %v1045_v0  ;;  %v244_v51 = vstv %s618_s10  ;;  %p840_p7 = pneg %p839_p3 }
  0x42   : > { %v643_v52 = vmul.f32 -1.442695, %v386_v44  ;;  %v245_v53 = vmul.f32 %v244_v51, %v1045_v0  ;;  %v252_v54 = vstv %s620_s11  ;;  %vm1077_vm11 = vcmp.lt.s32.totalorder %v292_v37, 256  ;;  %p844_p13 = por %p843_p12, %p842_p11 }
  0x43   : > { %v438_v55 = vadd.f32 %v650_v45, %v430_v48  ;;  %v242_v56 = vadd.f32 %v241_v47, %v240_v50  ;;  %v253_v57 = vmul.f32 %v252_v54, %v1045_v0  ;;  %v260_v58 = vstv %s622_s19 }
  0x44   : > { %747 = vpow2.f32 %v643_v52  ;;  %v619_v59 = vrot.slane %v245_v53, 9  ;;  %v261_v60 = vmul.f32 %v260_v58, %v1045_v0  ;;  %p845_p0 = pnand %p844_p13, %p840_p7 }
  0x45   : > { %v746_v61 = vpop.eup %745  ;;  %v446_v62 = vadd.f32 %v652_v49, %v438_v55  ;;  %v621_v63 = vrot.slane %v253_v57, 10 }
  0x46   : > { %v330_v1 = vadd.f32 1.0, %v746_v61  ;;  %v250_v2 = vadd.f32 %v619_v59, %v242_v56  ;;  %v623_v4 = vrot.slane %v261_v60, 11 }
  0x47   : > { %v653_v3 = vmul.f32 -1.442695, %v446_v62 }
  0x48   : > { %749 = vrcp.f32 %v330_v1  ;;  %v258_v5 = vadd.f32 %v621_v63, %v250_v2  ;;  %v342_v13 = vand.u32 2147483648, %v330_v1  ;;  %vm336_vm0 = vweird.f32 %v330_v1 }
  0x49   : > { %751 = vpow2.f32 %v653_v3  ;;  %v340_v16 = vand.u32 2147483647, %v330_v1 }
  0x4a   : > { %v748_v6 = vpop.eup %747  ;;  %v266_v8 = vadd.f32 %v623_v4, %v258_v5  ;;  %v343_v19 = vor.u32 1.1754944e-38, %v342_v13 }
  0x4b   : > { %v390_v7 = vadd.f32 1.0, %v748_v6  ;;  %vm341_vm3 = vcmp.eq.f32.partialorder %v340_v16, 8.507059e+37 }
  0x4c   : > { %v624_v10 = vmul.f32 -1.442695, %v266_v8 }
  0x4d   : > { %753 = vrcp.f32 %v390_v7  ;;  %v402_v22 = vand.u32 2147483648, %v390_v7  ;;  %vm396_vm4 = vweird.f32 %v390_v7  ;;  %v400_v25 = vand.u32 2147483647, %v390_v7 }
  0x4e   : > { %v750_v9 = vpop.eup %749  ;;  %755 = vpow2.f32 %v624_v10 }
  0x4f   : > { %v752_v11 = vpop.eup %751  ;;  %v332_v12 = vmul.f32 %v750_v9, %v330_v1  ;;  %vm337_vm1 = vweird.f32 %v750_v9  ;;  %v403_v32 = vor.u32 1.1754944e-38, %v402_v22  ;;  %vm401_vm7 = vcmp.eq.f32.partialorder %v400_v25, 8.507059e+37 }
  0x50   : > { %v450_v14 = vadd.f32 1.0, %v752_v11  ;;  %vm338_vm2 = vmor %vm336_vm0, %vm337_vm1  ;;  %vm289_vm1 = vcmask 1040384  }
  0x51   : > { %v333_v15 = vsub.f32 1.0, %v332_v12 }
  0x52   : > { %757 = vrcp.f32 %v450_v14  ;;  %vm456_vm8 = vweird.f32 %v450_v14  ;;  %v462_v39 = vand.u32 2147483648, %v450_v14  ;;  %v460_v42 = vand.u32 2147483647, %v450_v14 }
  0x53   : > { %v754_v17 = vpop.eup %753  ;;  %v334_v18 = vmul.f32 %v750_v9, %v333_v15 }
  0x54   : > { %v392_v20 = vmul.f32 %v754_v17, %v390_v7  ;;  %v756_v23 = vpop.eup %755  ;;  %vm397_vm5 = vweird.f32 %v754_v17  ;;  %v463_v48 = vor.u32 1.1754944e-38, %v462_v39  ;;  %vm461_vm12 = vcmp.eq.f32.partialorder %v460_v42, 8.507059e+37 }
  0x55   : > { %v335_v21 = vadd.f32 %v750_v9, %v334_v18  ;;  %v270_v27 = vadd.f32 1.0, %v756_v23  ;;  %vm398_vm6 = vmor %vm396_vm4, %vm397_vm5 }
  0x56   : > { %v393_v24 = vsub.f32 1.0, %v392_v20 }
  0x57   : > { %v339_v26 = vsel %vm338_vm2, %v750_v9, %v335_v21  ;;  %759 = vrcp.f32 %v270_v27  ;;  %vm276_vm13 = vweird.f32 %v270_v27  ;;  %v282_v51 = vand.u32 2147483648, %v270_v27 }
  0x58   : > { %v758_v28 = vpop.eup %757  ;;  %v344_v29 = vsel %vm341_vm3, %v343_v19, %v339_v26  ;;  %v394_v30 = vmul.f32 %v754_v17, %v393_v24  ;;  %v280_v54 = vand.u32 2147483647, %v270_v27 }
  0x59   : > { %v347_v31 = vrot.slane %v344_v29, 7  ;;  %v452_v33 = vmul.f32 %v758_v28, %v450_v14  ;;  %vm457_vm9 = vweird.f32 %v758_v28  ;;  %v283_v58 = vor.u32 1.1754944e-38, %v282_v51 }
  0x5a   : > { %v395_v34 = vadd.f32 %v754_v17, %v394_v30  ;;  %vm1073_vm10 = vmor %vm456_vm8, %vm457_vm9  ;;  %vm281_vm0 = vcmp.eq.f32.partialorder %v280_v54, 8.507059e+37 }
  0x5b   : > { %v349_v35 = vmul.f32 %v347_v31, %v1045_v0  ;;  %v453_v36 = vsub.f32 1.0, %v452_v33 }
  0x5c   : > { %v399_v38 = vsel %vm398_vm6, %v754_v17, %v395_v34 }
  0x5d   : > { %351 = vst [vmem:[#allocation1] sm:$0xff] %v349_v35  ;;  %v404_v40 = vsel %vm401_vm7, %v403_v32, %v399_v38  ;;  %v454_v41 = vmul.f32 %v758_v28, %v453_v36  ;;  %v760_v45 = vpop.eup %759 }
  0x5e   : > { %v407_v43 = vrot.slane %v404_v40, 6  ;;  %v272_v49 = vmul.f32 %v760_v45, %v270_v27  ;;  %vm277_vm14 = vweird.f32 %v760_v45 }
  0x5f   : > { %v455_v46 = vadd.f32 %v758_v28, %v454_v41  ;;  %vm278_vm15 = vmor %vm276_vm13, %vm277_vm14 }
  0x60   : > { %v409_v52 = vmul.f32 %v407_v43, %v1045_v0  ;;  %v273_v53 = vsub.f32 1.0, %v272_v49 }
  0x61   : > { %v459_v50 = vsel %vm1073_vm10, %v758_v28, %v455_v46 }
  0x62   : > { %v464_v56 = vsel %vm461_vm12, %v463_v48, %v459_v50  ;;  %v274_v57 = vmul.f32 %v760_v45, %v273_v53 }
  0x63   : > { %v467_v60 = vrot.slane %v464_v56, 5 }
  0x64   : > { %v353_v55 = vld [vmem:[#allocation1 + $0x1] ss:$4 sm:$0xff]  ;;  %v275_v59 = vadd.f32 %v760_v45, %v274_v57 }
  0x65   : > { %634 = vst.msk [vmem:[%s233_s21 + $0x1] ss:$4 sm:$0x3] %vm1077_vm11, %v353_v55  ;;  %v469_v1 = vmul.f32 %v467_v60, %v1045_v0 }
  0x66   : > { %411 = vst [vmem:[#allocation1] sm:$0xff] %v409_v52  ;;  %v279_v61 = vsel %vm278_vm15, %v760_v45, %v275_v59 }
  0x67   : > { %v284_v62 = vsel %vm281_vm0, %v283_v58, %v279_v61 }
  0x68   : > { %v286_v63 = vmul.f32 %v284_v62, %v1045_v0 }
  0x6a   : > { %v288_v2 = vrot.slane %v286_v63, 3 }
  0x6c   : > { %v290_v4 = vsel %vm289_vm1, %v286_v63, %v288_v2 }
  0x6d   : > { %v413_v3 = vld [vmem:[#allocation1 + $0x2] ss:$4 sm:$0xff]  ;;  %296 = vst.msk [vmem:[%s233_s21] ss:$4 sm:$0x3] %vm1077_vm11, %v290_v4 }
  0x6e   : > { %644 = vst.msk [vmem:[%s233_s21 + $0x2] ss:$4 sm:$0x3] %vm1077_vm11, %v413_v3 }
  0x6f   : > { %471 = vst [vmem:[#allocation1] sm:$0xff] %v469_v1 }
  0x76   : > { %v473_v0 = vld [vmem:[#allocation1 + $0x3] ss:$4 sm:$0xff] }
  0x77   : > { %654 = vst.msk [vmem:[%s233_s21 + $0x3] ss:$4 sm:$0x3] %vm1077_vm11, %v473_v0 }
  0x78   : > { %848 = shalt.err (!%p845_p0)
}
  0x79   : > { %672 = dma.vmem_to_hbm [thread:$0]  (%p1007_p2), %s494_s25, 128, %s496_s27, %s478_s15  }
  0x7a PF: > { %s507_s30 = sand.u32 1, %s891_s12   ;;  %p686_p4 = pnand %p609_p8, %p980_p5 }
  0x7b   : > { %s508_s11 = scalar_lea.sflag [#allocation4], %s507_s30 }
  0x7c   : > { %p687_p6 = pneg %p686_p4 }
  0x7e   : > { %886 = dma.done.wait (%p687_p6), %s508_s11, 128  }
  0x7f   : > { %888 = vsyncadd (%p687_p6), %s508_s11, 4294967168  ;;  %s21_s17 = sadd.s32 1, %s911_s17   ;;  %s1147_s12 = smov %s895_s13 }
  0x80   : > { %p18_p9 = scmp.ge.s32.totalorder %s21_s17, 4   ;;  %s1148_s13 = smov %s899_s14 }
  0x81   : > { %s1149_s14 = smov %s1017_s18  ;;  %s1150_s15 = smov %s907_s16 }
  0x82   : > { %s1151_s16 = smov %s1153_s5  ;;  %20 = sbr.rel (!%p18_p9) target bundleno = 8 (0x8), region = 93 }
  0x87   :  { %514 = vsyncpa [#allocation3], 1 }
  0x88   :  { %516 = vsyncpa [#allocation3 + $0x1], 1 }
  0x89   :  { %517 = vsyncpa [#allocation4], 1 }
  0x8a   :  { %519 = vsyncpa [#allocation4 + $0x1], 1 }
  0x8b   :  { %520 = vsyncpa [#allocation5], 1 }
  0x8c   :  { %522 = vsyncpa [#allocation5 + $0x1], 1 }
  0x8d   :  { %523 = vsyncpa [#allocation6], 1 }
  0x8e   :  { %525 = vsyncpa [#allocation6 + $0x1], 1 }

</bundles_post_ra>
